<compile_context>
chip_gen: v5e
topology: v5e:2x2
jax: 0.10.0
libtpu: 0.0.40
codegen_flags: <defaults>
</compile_context>

<pallas_src>
import jax
import jax.numpy as jnp
import numpy as np
from jax.experimental import pallas as pl
from jax.experimental.pallas import tpu as pltpu


def _vae_kernel(w_mu_ref, b_mu_ref, w_lv_ref, b_lv_ref, w_dec_ref, b_dec_ref,
                x_ref, eps_ref, recon_ref, mu_ref, logvar_ref):
    # x_ref:     (C_in, tpix)   VMEM
    # eps_ref:   (L, tpix)      VMEM
    # w_mu_ref:  (L, C_in)      VMEM   (encoder rows producing mu)
    # w_lv_ref:  (L, C_in)      VMEM   (encoder rows producing log_var)
    # w_dec_ref: (C_out, L)     VMEM
    # b_*_ref:   (C, 1)         VMEM   (lane-broadcast bias columns)
    x = x_ref[...]                                            # (C_in, tpix) f32

    # ---- Encoder (per-pixel linear), full-height tiles on the MXU ----------
    mu = jnp.dot(w_mu_ref[...], x,
                 preferred_element_type=jnp.float32) + b_mu_ref[...]
    log_var = jnp.dot(w_lv_ref[...], x,
                      preferred_element_type=jnp.float32) + b_lv_ref[...]

    # ---- Sampling: z = eps * exp(0.5 * log_var) + mu  (VPU/EUP only) -------
    z = eps_ref[...] * jnp.exp(0.5 * log_var) + mu            # (L, tpix)

    # ---- Decoder (per-pixel linear) -----------------------------------------
    recon = jnp.dot(w_dec_ref[...], z,
                    preferred_element_type=jnp.float32) + b_dec_ref[...]

    recon_ref[...] = recon.astype(recon_ref.dtype)
    mu_ref[...] = mu.astype(mu_ref.dtype)
    logvar_ref[...] = log_var.astype(logvar_ref.dtype)


def _round_up(x, m):
    return ((x + m - 1) // m) * m


def _choose_tpix(hw, batch, max_tpix=8192):
    """Lane-dense pixel tile: multiple of 128, capped, and (when possible)
    chosen so the grid has >= 2 program instances for v7x's two TensorCores."""
    hw128 = max(128, _round_up(hw, 128))
    tpix = min(max_tpix, hw128)
    tpix = max(128, (tpix // 128) * 128)
    if batch * pl.cdiv(hw128, tpix) < 2 and hw128 >= 256:
        tpix = max(128, ((hw128 // 2) // 128) * 128)
    return tpix


def vae_lr_forward(x_nchw, w_enc, b_enc, w_dec, b_dec, eps_nchw, *,
                   max_tpix=8192):
    """x_nchw: [B, C_in, H, W]; eps_nchw: [B, L, H, W].
    Returns (recon [B, C_out, H, W], mu [B, L, H, W], log_var [B, L, H, W])."""
    B, C_in, H, W = x_nchw.shape
    two_L = w_enc.shape[1]
    L = two_L // 2
    C_out = w_dec.shape[1]
    HW = H * W

    tpix = _choose_tpix(HW, B, max_tpix)
    hw_pad = _round_up(HW, tpix)
    n_pix_blocks = hw_pad // tpix

    # NCHW is already channel-major with contiguous pixels: reshape is free.
    x3 = x_nchw.reshape(B, C_in, HW)
    eps3 = eps_nchw.reshape(B, L, HW)
    if hw_pad != HW:
        x3 = jnp.pad(x3, ((0, 0), (0, 0), (0, hw_pad - HW)))
        eps3 = jnp.pad(eps3, ((0, 0), (0, 0), (0, hw_pad - HW)))

    # Pre-split / pre-transpose the tiny channel-mixer weights (free in XLA):
    # chunk(2, dim=1) on NCHW -> first L encoder output channels are mu.
    w_mu_t = jnp.transpose(w_enc[:, :L]).astype(jnp.float32)      # (L, C_in)
    w_lv_t = jnp.transpose(w_enc[:, L:]).astype(jnp.float32)      # (L, C_in)
    w_dec_t = jnp.transpose(w_dec).astype(jnp.float32)            # (C_out, L)
    b_mu = b_enc[:L].reshape(L, 1).astype(jnp.float32)
    b_lv = b_enc[L:].reshape(L, 1).astype(jnp.float32)
    b_dec_c = b_dec.reshape(C_out, 1).astype(jnp.float32)

    # Per-step VMEM footprint (sublane-padded, double-buffered) -> declare it.
    def _rows(r):
        return _round_up(r, 8)
    per_buf_bytes = (_rows(C_in) + 3 * _rows(L) + _rows(C_out)) * tpix * 4
    vmem_limit = int(min(max(2 * per_buf_bytes + (2 << 20), 4 << 20), 32 << 20))

    vmem_spec = pl.BlockSpec(memory_space=pltpu.MemorySpace.VMEM)

    recon, mu, logvar = pl.pallas_call(
        _vae_kernel,
        out_shape=(
            jax.ShapeDtypeStruct((B, C_out, hw_pad), jnp.float32),
            jax.ShapeDtypeStruct((B, L, hw_pad), jnp.float32),
            jax.ShapeDtypeStruct((B, L, hw_pad), jnp.float32),
        ),
        grid_spec=pltpu.PrefetchScalarGridSpec(
            num_scalar_prefetch=0,
            grid=(B, n_pix_blocks),
            in_specs=[
                vmem_spec,                                                # w_mu
                vmem_spec,                                                # b_mu
                vmem_spec,                                                # w_lv
                vmem_spec,                                                # b_lv
                vmem_spec,                                                # w_dec
                vmem_spec,                                                # b_dec
                pl.BlockSpec((None, C_in, tpix), lambda b, p: (b, 0, p)),  # x
                pl.BlockSpec((None, L, tpix), lambda b, p: (b, 0, p)),     # eps
            ],
            out_specs=[
                pl.BlockSpec((None, C_out, tpix), lambda b, p: (b, 0, p)),
                pl.BlockSpec((None, L, tpix), lambda b, p: (b, 0, p)),
                pl.BlockSpec((None, L, tpix), lambda b, p: (b, 0, p)),
            ],
        ),
        compiler_params=pltpu.CompilerParams(
            dimension_semantics=("parallel", "parallel"),
            vmem_limit_bytes=vmem_limit),
    )(w_mu_t, b_mu, w_lv_t, b_lv, w_dec_t, b_dec_c, x3, eps3)

    if hw_pad != HW:
        recon = recon[:, :, :HW]
        mu = mu[:, :, :HW]
        logvar = logvar[:, :, :HW]

    return (recon.reshape(B, C_out, H, W),
            mu.reshape(B, L, H, W),
            logvar.reshape(B, L, H, W))


if __name__ == "__main__":
    # Small shapes consistent with the module's forward:
    # x: [B=2, C_in=4, H=16, W=16]; latent channels L=4 (encoder emits 2L=8);
    # decoder maps L -> C_out=4.
    B, C_in, H, W = 2, 4, 16, 16
    L, C_out = 4, 4

    key = jax.random.PRNGKey(0)
    kx, kwe, kbe, kwd, kbd, keps = jax.random.split(key, 6)

    x = jax.random.normal(kx, (B, C_in, H, W), dtype=jnp.float32)
    w_enc = 0.1 * jax.random.normal(kwe, (C_in, 2 * L), dtype=jnp.float32)
    b_enc = 0.1 * jax.random.normal(kbe, (2 * L,), dtype=jnp.float32)
    w_dec = 0.1 * jax.random.normal(kwd, (L, C_out), dtype=jnp.float32)
    b_dec = 0.1 * jax.random.normal(kbd, (C_out,), dtype=jnp.float32)
    # eps ~ N(0,1), same role as torch.randn_like(std)
    eps = jax.random.normal(keps, (B, L, H, W), dtype=jnp.float32)

    recon, mu, log_var = vae_lr_forward(x, w_enc, b_enc, w_dec, b_dec, eps)
    jax.block_until_ready((recon, mu, log_var))

    # Pure-JAX reference check (channel-major math, identical semantics).
    x3 = x.reshape(B, C_in, H * W)
    e3 = eps.reshape(B, L, H * W)
    enc = jnp.einsum('kc,bkp->bcp', w_enc, x3) + b_enc[None, :, None]
    mu_r, lv_r = enc[:, :L, :], enc[:, L:, :]
    z_r = e3 * jnp.exp(0.5 * lv_r) + mu_r
    rec_r = jnp.einsum('kc,bkp->bcp', w_dec, z_r) + b_dec[None, :, None]
    rec_r = rec_r.reshape(B, C_out, H, W)
    mu_r = mu_r.reshape(B, L, H, W)
    lv_r = lv_r.reshape(B, L, H, W)

    np.testing.assert_allclose(np.asarray(recon), np.asarray(rec_r),
                               rtol=1e-5, atol=1e-5)
    np.testing.assert_allclose(np.asarray(mu), np.asarray(mu_r),
                               rtol=1e-5, atol=1e-5)
    np.testing.assert_allclose(np.asarray(log_var), np.asarray(lv_r),
                               rtol=1e-5, atol=1e-5)

    print("KERNEL_OK")
</pallas_src>

<mosaic_0001>
module attributes {stable_mosaic.version = 11 : i64} {
  func.func @_vae_kernel(%arg0: i32, %arg1: i32, %arg2: memref<4x4xf32, #tpu.memory_space<vmem>>, %arg3: memref<4x1xf32, #tpu.memory_space<vmem>>, %arg4: memref<4x4xf32, #tpu.memory_space<vmem>>, %arg5: memref<4x1xf32, #tpu.memory_space<vmem>>, %arg6: memref<4x4xf32, #tpu.memory_space<vmem>>, %arg7: memref<4x1xf32, #tpu.memory_space<vmem>>, %arg8: memref<1x4x256xf32, #tpu.memory_space<vmem>>, %arg9: memref<1x4x256xf32, #tpu.memory_space<vmem>>, %arg10: memref<1x4x256xf32, #tpu.memory_space<vmem>>, %arg11: memref<1x4x256xf32, #tpu.memory_space<vmem>>, %arg12: memref<1x4x256xf32, #tpu.memory_space<vmem>>) attributes {dimension_semantics = [#tpu.dimension_semantics<parallel>, #tpu.dimension_semantics<parallel>], iteration_bounds = array<i64: 2, 1>, scalar_prefetch = 0 : i64, scratch_operands = 0 : i64, tpu.core_type = #tpu.core_type<tc>, window_params = [{pipeline_mode = #tpu.pipeline_mode<synchronous>, transform_indices = @transform_0, window_bounds = array<i64: 4, 4>}, {pipeline_mode = #tpu.pipeline_mode<synchronous>, transform_indices = @transform_1, window_bounds = array<i64: 4, 1>}, {pipeline_mode = #tpu.pipeline_mode<synchronous>, transform_indices = @transform_2, window_bounds = array<i64: 4, 4>}, {pipeline_mode = #tpu.pipeline_mode<synchronous>, transform_indices = @transform_3, window_bounds = array<i64: 4, 1>}, {pipeline_mode = #tpu.pipeline_mode<synchronous>, transform_indices = @transform_4, window_bounds = array<i64: 4, 4>}, {pipeline_mode = #tpu.pipeline_mode<synchronous>, transform_indices = @transform_5, window_bounds = array<i64: 4, 1>}, {transform_indices = @transform_6, window_bounds = array<i64: 1, 4, 256>}, {transform_indices = @transform_7, window_bounds = array<i64: 1, 4, 256>}, {transform_indices = @transform_8, window_bounds = array<i64: 1, 4, 256>}, {transform_indices = @transform_9, window_bounds = array<i64: 1, 4, 256>}, {transform_indices = @transform_10, window_bounds = array<i64: 1, 4, 256>}]} {
    %c0 = arith.constant 0 : index
    %c0_0 = arith.constant 0 : index
    %c0_1 = arith.constant 0 : index
    %0 = vector.load %arg8[%c0, %c0_0, %c0_1] : memref<1x4x256xf32, #tpu.memory_space<vmem>>, vector<1x4x256xf32>
    %1 = vector.shape_cast %0 : vector<1x4x256xf32> to vector<4x256xf32>
    %c0_2 = arith.constant 0 : index
    %c0_3 = arith.constant 0 : index
    %2 = vector.load %arg2[%c0_2, %c0_3] : memref<4x4xf32, #tpu.memory_space<vmem>>, vector<4x4xf32>
    %cst = arith.constant dense<0.000000e+00> : vector<4x256xf32>
    %3 = tpu.matmul %2, %1, %cst {dimension_numbers = #tpu.dot_dimension_numbers<[1], [0], [0], [1], [0, 0, 1, 1], [], []>} : vector<4x4xf32>, vector<4x256xf32>, vector<4x256xf32> -> vector<4x256xf32>
    %c0_4 = arith.constant 0 : index
    %c0_5 = arith.constant 0 : index
    %4 = vector.load %arg3[%c0_4, %c0_5] : memref<4x1xf32, #tpu.memory_space<vmem>>, vector<4x1xf32>
    %5 = vector.broadcast %4 : vector<4x1xf32> to vector<4x256xf32>
    %6 = arith.addf %3, %5 : vector<4x256xf32>
    %c0_6 = arith.constant 0 : index
    %c0_7 = arith.constant 0 : index
    %7 = vector.load %arg4[%c0_6, %c0_7] : memref<4x4xf32, #tpu.memory_space<vmem>>, vector<4x4xf32>
    %cst_8 = arith.constant dense<0.000000e+00> : vector<4x256xf32>
    %8 = tpu.matmul %7, %1, %cst_8 {dimension_numbers = #tpu.dot_dimension_numbers<[1], [0], [0], [1], [0, 0, 1, 1], [], []>} : vector<4x4xf32>, vector<4x256xf32>, vector<4x256xf32> -> vector<4x256xf32>
    %c0_9 = arith.constant 0 : index
    %c0_10 = arith.constant 0 : index
    %9 = vector.load %arg5[%c0_9, %c0_10] : memref<4x1xf32, #tpu.memory_space<vmem>>, vector<4x1xf32>
    %10 = vector.broadcast %9 : vector<4x1xf32> to vector<4x256xf32>
    %11 = arith.addf %8, %10 : vector<4x256xf32>
    %c0_11 = arith.constant 0 : index
    %c0_12 = arith.constant 0 : index
    %c0_13 = arith.constant 0 : index
    %12 = vector.load %arg9[%c0_11, %c0_12, %c0_13] : memref<1x4x256xf32, #tpu.memory_space<vmem>>, vector<1x4x256xf32>
    %13 = vector.shape_cast %12 : vector<1x4x256xf32> to vector<4x256xf32>
    %cst_14 = arith.constant 5.000000e-01 : f32
    %14 = vector.broadcast %cst_14 : f32 to vector<4x256xf32>
    %15 = arith.mulf %14, %11 : vector<4x256xf32>
    %16 = math.exp %15 : vector<4x256xf32>
    %17 = arith.mulf %13, %16 : vector<4x256xf32>
    %18 = arith.addf %17, %6 : vector<4x256xf32>
    %c0_15 = arith.constant 0 : index
    %c0_16 = arith.constant 0 : index
    %19 = vector.load %arg6[%c0_15, %c0_16] : memref<4x4xf32, #tpu.memory_space<vmem>>, vector<4x4xf32>
    %cst_17 = arith.constant dense<0.000000e+00> : vector<4x256xf32>
    %20 = tpu.matmul %19, %18, %cst_17 {dimension_numbers = #tpu.dot_dimension_numbers<[1], [0], [0], [1], [0, 0, 1, 1], [], []>} : vector<4x4xf32>, vector<4x256xf32>, vector<4x256xf32> -> vector<4x256xf32>
    %c0_18 = arith.constant 0 : index
    %c0_19 = arith.constant 0 : index
    %21 = vector.load %arg7[%c0_18, %c0_19] : memref<4x1xf32, #tpu.memory_space<vmem>>, vector<4x1xf32>
    %22 = vector.broadcast %21 : vector<4x1xf32> to vector<4x256xf32>
    %23 = arith.addf %20, %22 : vector<4x256xf32>
    %c0_20 = arith.constant 0 : index
    %c0_21 = arith.constant 0 : index
    %c0_22 = arith.constant 0 : index
    %24 = vector.load %arg10[%c0_20, %c0_21, %c0_22] : memref<1x4x256xf32, #tpu.memory_space<vmem>>, vector<1x4x256xf32>
    %25 = vector.shape_cast %24 : vector<1x4x256xf32> to vector<4x256xf32>
    %26 = vector.shape_cast %23 : vector<4x256xf32> to vector<1x4x256xf32>
    tpu.vector_store %arg10[%c0_20, %c0_21, %c0_22], %26 {strides = array<i32>} : memref<1x4x256xf32, #tpu.memory_space<vmem>>, vector<1x4x256xf32>,
    %c0_23 = arith.constant 0 : index
    %c0_24 = arith.constant 0 : index
    %c0_25 = arith.constant 0 : index
    %27 = vector.load %arg11[%c0_23, %c0_24, %c0_25] : memref<1x4x256xf32, #tpu.memory_space<vmem>>, vector<1x4x256xf32>
    %28 = vector.shape_cast %27 : vector<1x4x256xf32> to vector<4x256xf32>
    %29 = vector.shape_cast %6 : vector<4x256xf32> to vector<1x4x256xf32>
    tpu.vector_store %arg11[%c0_23, %c0_24, %c0_25], %29 {strides = array<i32>} : memref<1x4x256xf32, #tpu.memory_space<vmem>>, vector<1x4x256xf32>,
    %c0_26 = arith.constant 0 : index
    %c0_27 = arith.constant 0 : index
    %c0_28 = arith.constant 0 : index
    %30 = vector.load %arg12[%c0_26, %c0_27, %c0_28] : memref<1x4x256xf32, #tpu.memory_space<vmem>>, vector<1x4x256xf32>
    %31 = vector.shape_cast %30 : vector<1x4x256xf32> to vector<4x256xf32>
    %32 = vector.shape_cast %11 : vector<4x256xf32> to vector<1x4x256xf32>
    tpu.vector_store %arg12[%c0_26, %c0_27, %c0_28], %32 {strides = array<i32>} : memref<1x4x256xf32, #tpu.memory_space<vmem>>, vector<1x4x256xf32>,
    return
  }
  func.func @transform_0(%arg0: i32, %arg1: i32) -> (i32, i32) {
    %c0_i32 = arith.constant 0 : i32
    %c0_i32_0 = arith.constant 0 : i32
    %c0_i32_1 = arith.constant 0 : i32
    return %c0_i32, %c0_i32_0 : i32, i32
  }
  func.func @transform_1(%arg0: i32, %arg1: i32) -> (i32, i32) {
    %c0_i32 = arith.constant 0 : i32
    %c0_i32_0 = arith.constant 0 : i32
    %c0_i32_1 = arith.constant 0 : i32
    return %c0_i32, %c0_i32_0 : i32, i32
  }
  func.func @transform_2(%arg0: i32, %arg1: i32) -> (i32, i32) {
    %c0_i32 = arith.constant 0 : i32
    %c0_i32_0 = arith.constant 0 : i32
    %c0_i32_1 = arith.constant 0 : i32
    return %c0_i32, %c0_i32_0 : i32, i32
  }
  func.func @transform_3(%arg0: i32, %arg1: i32) -> (i32, i32) {
    %c0_i32 = arith.constant 0 : i32
    %c0_i32_0 = arith.constant 0 : i32
    %c0_i32_1 = arith.constant 0 : i32
    return %c0_i32, %c0_i32_0 : i32, i32
  }
  func.func @transform_4(%arg0: i32, %arg1: i32) -> (i32, i32) {
    %c0_i32 = arith.constant 0 : i32
    %c0_i32_0 = arith.constant 0 : i32
    %c0_i32_1 = arith.constant 0 : i32
    return %c0_i32, %c0_i32_0 : i32, i32
  }
  func.func @transform_5(%arg0: i32, %arg1: i32) -> (i32, i32) {
    %c0_i32 = arith.constant 0 : i32
    %c0_i32_0 = arith.constant 0 : i32
    %c0_i32_1 = arith.constant 0 : i32
    return %c0_i32, %c0_i32_0 : i32, i32
  }
  func.func @transform_6(%arg0: i32, %arg1: i32) -> (i32, i32, i32) {
    %c0_i32 = arith.constant 0 : i32
    %c0_i32_0 = arith.constant 0 : i32
    return %arg0, %c0_i32, %arg1 : i32, i32, i32
  }
  func.func @transform_7(%arg0: i32, %arg1: i32) -> (i32, i32, i32) {
    %c0_i32 = arith.constant 0 : i32
    %c0_i32_0 = arith.constant 0 : i32
    return %arg0, %c0_i32, %arg1 : i32, i32, i32
  }
  func.func @transform_8(%arg0: i32, %arg1: i32) -> (i32, i32, i32) {
    %c0_i32 = arith.constant 0 : i32
    %c0_i32_0 = arith.constant 0 : i32
    return %arg0, %c0_i32, %arg1 : i32, i32, i32
  }
  func.func @transform_9(%arg0: i32, %arg1: i32) -> (i32, i32, i32) {
    %c0_i32 = arith.constant 0 : i32
    %c0_i32_0 = arith.constant 0 : i32
    return %arg0, %c0_i32, %arg1 : i32, i32, i32
  }
  func.func @transform_10(%arg0: i32, %arg1: i32) -> (i32, i32, i32) {
    %c0_i32 = arith.constant 0 : i32
    %c0_i32_0 = arith.constant 0 : i32
    return %arg0, %c0_i32, %arg1 : i32, i32, i32
  }
}

</mosaic_0001>

<bundles_post_ra>
// kernel: tpu_custom_call.1
= control target key start
LH: loop header
LB: loop body
LE: loop exit
PB: predicated region body
PF: predicated region fallthrough
CT: control target
= control target key end

     0   :  { %s1532_s0 = inlined_call_operand.vmem [shape: f32[4,4], index: 0, kind: input, shape index: {}]   ;;  %s1533_s1 = inlined_call_operand.vmem [shape: f32[4,1], index: 1, kind: input, shape index: {}]   ;;  %s1534_s2 = inlined_call_operand.vmem [shape: f32[4,4], index: 2, kind: input, shape index: {}]   ;;  %s1535_s3 = inlined_call_operand.vmem [shape: f32[4,1], index: 3, kind: input, shape index: {}]   ;;  %s1536_s4 = inlined_call_operand.vmem [shape: f32[4,4], index: 4, kind: input, shape index: {}]   ;;  %s1537_s5 = inlined_call_operand.vmem [shape: f32[4,1], index: 5, kind: input, shape index: {}]   ;;  %s1538_s6 = inlined_call_operand.hbm [shape: f32[2,4,256], index: 6, kind: input, shape index: {}]   ;;  %s1539_s7 = inlined_call_operand.hbm [shape: f32[2,4,256], index: 7, kind: input, shape index: {}]   ;;  %s1540_s8 = inlined_call_operand.hbm [shape: f32[2,4,256], index: 8, kind: output, shape index: {0}]   ;;  %s1541_s9 = inlined_call_operand.hbm [shape: f32[2,4,256], index: 9, kind: output, shape index: {1}]   ;;  %s1542_s10 = inlined_call_operand.hbm [shape: f32[2,4,256], index: 10, kind: output, shape index: {2}]  }
   0x1   :  { %1551 = sst [smem:[#allocation21_spill]] %s1540_s8 }
   0x2   :  { %1552 = sst [smem:[#allocation22_spill]] %s1542_s10 }
   0x3   :  { %16 = vsyncpa [#allocation3], 0 }
   0x4   :  { %18 = vsyncpa [#allocation3 + $0x1], 0 }
   0x5   :  { %19 = vsyncpa [#allocation6], 0 }
   0x6   :  { %21 = vsyncpa [#allocation6 + $0x1], 0 }
   0x7   :  { %22 = vsyncpa [#allocation4], 0 }
   0x8   :  { %24 = vsyncpa [#allocation4 + $0x1], 0 }
   0x9   :  { %25 = vsyncpa [#allocation9], 0 }
   0xa   :  { %27 = vsyncpa [#allocation9 + $0x1], 0  ;;  %s1309_s13 = smov 0   ;;  %s1311_s14 = smov 0  }
   0xb   :  { %s1313_s15 = smov 0   ;;  %s1315_s16 = smov 0  }
   0xc   :  { %s1317_s17 = smov 0   ;;  %s1319_s18 = smov 0  }
   0xd LB: > { %1553 = sst [smem:[#allocation15_spill]] %s1231_s13  ;;  %s1340_s19 = sadd.s32 4294967295, %s1251_s18   ;;  %s1251_s18 = sphi %s1319_s18, %s33_s18   ;;  %s1247_s17 = sphi %s1317_s17, %s1571_s17   ;;  %s1243_s16 = sphi %s1315_s16, %s1570_s16   ;;  %s1239_s15 = sphi %s1313_s15, %s1569_s15   ;;  %s1235_s14 = sphi %s1311_s14, %s1573_s14   ;;  %s1231_s13 = sphi %s1309_s13, %s1572_s13  }
   0xe   : > { %1554 = sst [smem:[#allocation16_spill]] %s1239_s15  ;;  %s1547_s20 = sadd.s32 4294967294, %s1251_s18  }
   0xf   : > { %1555 = sst [smem:[#allocation17_spill]] %s1247_s17  ;;  %s45_s21 = sadd.s32 1, %s1247_s17 }
  0x10   : > { %s180_s22 = sadd.s32 1, %s1239_s15  ;;  %p47_p0 = scmp.ge.s32.totalorder %s45_s21, 2 }
  0x11   : > { %p187_p1 = scmp.ne.s32.totalorder %s1239_s15, %s1235_s14  ;;  %p188_p2 = scmp.eq.s32.totalorder %s1251_s18, 0 }
  0x12   : > { %p193_p3 = scmp.ne.s32.totalorder %s1235_s14, %s1231_s13  ;;  %s1575_s21 = smov (%p47_p0, %s45_s21), 0 }
  0x13   : > { %1556 = sst [smem:[#allocation18_spill]] %s1575_s21  ;;  %p1352_p4 = por %p188_p2, %p187_p1 }
  0x14   : > { %p194_p5 = scmp.eq.s32.totalorder %s1340_s19, 0  ;;  %s175_s24 = ssub.s32 %s1247_s17, %s1575_s21 }
  0x15   : > { %p247_p6 = scmp.eq.s32.totalorder %s1340_s19, 1  ;;  %p178_p7 = scmp.eq.s32.totalorder %s175_s24, 0 }
  0x16   : > { %p1360_p8 = por %p194_p5, %p193_p3  ;;  %p253_p10 = scmp.eq.s32.totalorder %s1547_s20, 1 }
  0x17   : > { %p1364_p9 = por %p247_p6, %p187_p1  ;;  %p920_p12 = scmp.ge.s32.totalorder %s1251_s18, 2 }
  0x18   : > { %s1371_s27 = scalar_select %p178_p7, %s1239_s15, %s180_s22  }
  0x19   : > { %p1373_p11 = por %p253_p10, %p193_p3  ;;  %p988_p13 = scmp.lt.s32.totalorder %s1251_s18, 2 }
  0x1a   : > { %1560 = sst [smem:[#allocation19_spill]] %s1371_s27  ;;  %s347_s29 = sand.u32 1, %s1239_s15  }
  0x1b   : > { %s1561_s28 = scalar_select %p1373_p11, 1, 0 }
  0x1c   : > { %s921_s30 = sshll.u32 %s347_s29, 3  ;;  %s956_s11 = sshll.u32 %s1247_s17, 3 }
  0x1d   : > { %1562 = sst [smem:[#allocation20_spill]] %s1561_s28  ;;  %s358_s21 = scalar_lea.hbm %s1538_s6, %s956_s11 }
  0x1e   : > { %s351_s13 = scalar_lea.vmem [#allocation2], %s921_s30  ;;  %s360_s10 = sshll.u32 %s358_s21, 4  ;;  %s361_s10 = int_to_ptr.hbm [resolvable:$true] %s360_s10 }
  0x1f   : > { %s362_s8 = sshll.u32 %s351_s13, 4  ;;  %p972_p0 = pnand %p988_p13, %p1352_p4  ;;  %s363_s8 = int_to_ptr.vmem [resolvable:$true] %s362_s8 }
  0x20   : > { %p927_p1 = scmp.ge.s32.totalorder %s1251_s18, 1  ;;  %p389_p2 = scmp.lt.s32.totalorder %s1251_s18, 3 }
  0x21   : > { %s348_s22 = scalar_lea.sflag [#allocation3], %s347_s29  ;;  %s380_s17 = scalar_lea.hbm %s1539_s7, %s956_s11 }
  0x22   : > { %974 = dma.hbm_to_vmem [thread:$0]  (!%p972_p0), %s361_s10, 128, %s363_s8, %s348_s22  }
  0x23   : > { %p390_p3 = pnand %p927_p1, %p389_p2  ;;  %s373_s15 = scalar_lea.vmem [#allocation5], %s921_s30 }
  0x24   : > { %s384_s28 = sshll.u32 %s373_s15, 4  ;;  %s382_s12 = sshll.u32 %s380_s17, 4  ;;  %s385_s28 = int_to_ptr.vmem [resolvable:$true] %s384_s28  ;;  %s383_s12 = int_to_ptr.hbm [resolvable:$true] %s382_s12 }
  0x25   : > { %s370_s13 = scalar_lea.sflag [#allocation6], %s347_s29  ;;  %393 = sbr.rel (%p390_p3) target bundleno = 358 (0x166), region = 52 }
  0x26   : > { %977 = dma.hbm_to_vmem [thread:$0]  (!%p972_p0), %s383_s12, 128, %s385_s28, %s370_s13  }
  0x27   : > { %s1392_s21 = sand.u32 (!%p390_p3), 1, %s1235_s14  }
  0x28   : > { %s1395_s8 = sshll.u32 (!%p390_p3), %s1392_s21, 3  ;;  %s396_s10 = scalar_lea.sflag (!%p390_p3), [#allocation3], %s1392_s21 }
  0x29   : > { %s399_s20 = scalar_lea.vmem (!%p390_p3), [#allocation2], %s1395_s8 }
  0x2a   : > { %1214 = dma.done.wait (%p1360_p8), %s396_s10, 128  }
  0x2b   : > { %1216 = vsyncadd (%p1360_p8), %s396_s10, 4294967168  ;;  %s406_s15 = scalar_lea.sflag [#allocation6], %s1392_s21  ;;  %s409_s17 = scalar_lea.vmem [#allocation5], %s1395_s8 }
  0x2c   : > { %1218 = dma.done.wait (%p1360_p8), %s406_s15, 128  }
  0x2d   : > { %1220 = vsyncadd (%p1360_p8), %s406_s15, 4294967168  ;;  %v1253_v0 = vmov 0   ;;  %v467_v1 = vld [vmem:[%s399_s20] sm:$0xff]  ;;  %v529_v2 = vld [vmem:[%s1535_s3] sm:$0xf]  ;;  %vm483_vm0 = vcmask 1043456  }
  0x2e   : > { %1039 = vset.pattern.permute.xlu0 %v1253_v0  ;;  %1040 = vset.pattern.permute.xlu1 %v1253_v0  ;;  %476 = vst [vmem:[#allocation1] ss:$2 sm:$0xff] %v467_v1  ;;  %v468_v3 = vld [vmem:[%s1532_s0] sm:$0xf]  ;;  %vm479_vm1 = vcmask 31744   ;;  %s454_s22 = scalar_lea.vmem [#allocation8], %s1395_s8 }
  0x2f   : > { %532 = vperm.xlu0 %1039, %v529_v2   ;;  %v469_v4 = vld [vmem:[%s1533_s1] sm:$0xf]  ;;  %s461_s10 = scalar_lea.vmem [#allocation10], %s1395_s8  ;;  %s680_s29 = sand.u32 1, %s1340_s19  }
  0x30   : > { %v528_v7 = vld [vmem:[%s1534_s2] sm:$0xf]  ;;  %s718_s30 = sshll.u32 %s454_s22, 4  ;;  %s1460_s25 = scalar_lea.sflag [#allocation9], %s680_s29  ;;  %s719_s30 = int_to_ptr.vmem [resolvable:$true] %s718_s30 }
  0x31   : > { %v605_v18 = vld [vmem:[%s1537_s5] sm:$0xf]  ;;  %s1125_s20 = scalar_lea.hbm %s1541_s9, 16 }
  0x32   : > { %608 = vperm.xlu1 %1040, %v605_v18   ;;  %v585_v30 = vld [vmem:[%s409_s17] sm:$0xff]  ;;  %s1449_s17 = sshll.u32 %s1243_s16, 3 }
  0x33   : > { %v604_v36 = vld [vmem:[%s1536_s4] sm:$0xf]  ;;  %s716_s28 = scalar_lea.hbm %s1541_s9, %s1449_s17 }
  0x34   : > { %s720_s11 = sshll.u32 %s716_s28, 4  ;;  %s721_s11 = int_to_ptr.hbm [resolvable:$true] %s720_s11 }
  0x35   : > { %v477_v5 = vld.sshfl [vmem:[#allocation1] sm:$0xff pattern:$0x75316420]  ;;  %v478_v6 = vld.sshfl [vmem:[#allocation1 + $0x8] sm:$0xff pattern:$0x75316420] }
  0x36   : > { %535 = vst [vmem:[#allocation1] ss:$2 sm:$0xff] %v467_v1  ;;  %935 = vmatpush.msk.msra.mxu1 %vm483_vm0, %v478_v6  ;;  %933 = vmatpush.msk.msra.mxu0 %vm483_vm0, %v477_v5  ;;  %s1119_s24 = sshra.s32 %s721_s11, 4  ;;  %s1120_s24 = int_to_ptr.hbm [resolvable:$true] %s1119_s24 }
  0x37   : > { %936 = vmatmul.msk.f32.vlgmr.msra.gmra.mxu1 %vm479_vm1, %v468_v3  ;;  %934 = vmatmul.msk.f32.vlgmr.msra.gmra.mxu0 %vm479_vm1, %v468_v3  ;;  %s1121_s16 = scalar_lea.hbm %s1120_s24, 8  ;;  %p1126_p7 = scmp.lt.s32.totalorder %s1120_s24, %s1541_s9 }
  0x38   : > { %472 = vperm.xlu0 %1039, %v469_v4   ;;  %p1122_p4 = scmp.ne.s32.totalorder %s1120_s24, %s1121_s16  ;;  %p1127_p8 = scmp.lt.s32.totalorder %s1125_s20, %s1121_s16 }
  0x3a   : > { %p1123_p5 = pnand %p1122_p4, %p1364_p9  ;;  %p1128_p10 = por %p1127_p8, %p1126_p7 }
  0x3c   : > { %p1124_p6 = pneg %p1123_p5 }
  0x3d   : > { %v536_v8 = vld.sshfl [vmem:[#allocation1] sm:$0xff pattern:$0x75316420]  ;;  %v537_v9 = vld.sshfl [vmem:[#allocation1 + $0x8] sm:$0xff pattern:$0x75316420] }
  0x3e   : > { %937 = vmatpush.msk.msra.mxu2 %vm483_vm0, %v536_v8  ;;  %939 = vmatpush.msk.msra.mxu3 %vm483_vm0, %v537_v9  ;;  %p1129_p13 = pnand %p1128_p10, %p1124_p6 }
  0x3f   : > { %938 = vmatmul.msk.f32.vlgmr.msra.gmra.mxu2 %vm479_vm1, %v528_v7  ;;  %940 = vmatmul.msk.f32.vlgmr.msra.gmra.mxu3 %vm479_vm1, %v528_v7 }
  0xa1   : > { %v533_v10 = vpop.permute.xlu0 %532 }
  0xaa   : > { %v473_v11 = vpop.permute.xlu0 %472 }
  0xb4   : > { %v525_v12 = vpop.f32.mrf.mxu1  ;;  %v505_v13 = vpop.f32.mrf.mxu0 }
  0xb5   : > { %v526_v14 = vadd.f32 %v525_v12, %v473_v11  ;;  %v506_v15 = vadd.f32 %v505_v13, %v473_v11 }
  0xb7   : > { %v600_v16 = vrot.slane %v526_v14, 4 }
  0xb9   : > { %v601_v17 = vsel %vm483_vm0, %v506_v15, %v600_v16 }
  0xba   : > { %668 = vst [vmem:[%s454_s22] sm:$0xff] %v601_v17 }
  0xc2   : > { %v562_v19 = vpop.f32.mrf.mxu2  ;;  %v582_v20 = vpop.f32.mrf.mxu3 }
  0xc3   : > { %v563_v21 = vadd.f32 %v562_v19, %v533_v10  ;;  %v583_v22 = vadd.f32 %v582_v20, %v533_v10 }
  0xc5   : > { %v586_v23 = vmul.f32 0.5, %v563_v21  ;;  %v587_v24 = vmul.f32 0.5, %v583_v22  ;;  %v671_v25 = vrot.slane %v583_v22, 4 }
  0xc7   : > { %v590_v26 = vmul.f32 1.442695, %v587_v24  ;;  %v672_v27 = vsel %vm483_vm0, %v563_v21, %v671_v25  ;;  %v588_v28 = vmul.f32 1.442695, %v586_v23 }
  0xc8   : > { %674 = vst [vmem:[%s461_s10] sm:$0xff] %v672_v27 }
  0xc9   : > { %1041 = vpow2.f32 %v590_v26 }
  0xca   : > { %1043 = vpow2.f32 %v588_v28 }
  0xcf   : > { %v1042_v29 = vpop.eup %1041 }
  0xd0   : > { %v594_v31 = vrot.slane %v1042_v29, 4  ;;  %v1044_v32 = vpop.eup %1043 }
  0xd2   : > { %v595_v33 = vsel %vm483_vm0, %v1044_v32, %v594_v31 }
  0xd3   : > { %v597_v34 = vmul.f32 %v595_v33, %v585_v30 }
  0xd5   : > { %v603_v35 = vadd.f32 %v601_v17, %v597_v34 }
  0xd7   : > { %612 = vst [vmem:[#allocation1] ss:$2 sm:$0xff] %v603_v35 }
  0xde   : > { %v613_v37 = vld.sshfl [vmem:[#allocation1] sm:$0xff pattern:$0x75316420]  ;;  %v614_v38 = vld.sshfl [vmem:[#allocation1 + $0x8] sm:$0xff pattern:$0x75316420] }
  0xdf   : > { %941 = vmatpush.msk.msrb.mxu0 %vm483_vm0, %v613_v37  ;;  %943 = vmatpush.msk.msrb.mxu1 %vm483_vm0, %v614_v38 }
  0xe0   : > { %944 = vmatmul.msk.f32.vlgmr.msrb.gmra.mxu1 %vm479_vm1, %v604_v36  ;;  %942 = vmatmul.msk.f32.vlgmr.msrb.gmra.mxu0 %vm479_vm1, %v604_v36 }
  0xe1   : > { %1132 = shalt.err (!%p1129_p13)
}
  0xe2   : > { %966 = dma.vmem_to_hbm [thread:$0]  (%p1364_p9), %s719_s30, 128, %s721_s11, %s1460_s25  }
  0xe3   : > { %s1563_s27 = sld [smem:[#allocation22_spill]]  ;;  %s735_s29 = sshll.u32 %s461_s10, 4  ;;  %s736_s29 = int_to_ptr.vmem [resolvable:$true] %s735_s29 }
  0xe9   : > { %s733_s28 = scalar_lea.hbm %s1563_s27, %s1449_s17  ;;  %s1153_s30 = scalar_lea.hbm %s1563_s27, 16 }
  0xea   : > { %s737_s12 = sshll.u32 %s733_s28, 4  ;;  %s738_s12 = int_to_ptr.hbm [resolvable:$true] %s737_s12 }
  0xeb   : > { %s1147_s24 = sshra.s32 %s738_s12, 4  ;;  %s1148_s24 = int_to_ptr.hbm [resolvable:$true] %s1147_s24 }
  0xec   : > { %s1149_s16 = scalar_lea.hbm %s1148_s24, 8  ;;  %p1154_p3 = scmp.lt.s32.totalorder %s1148_s24, %s1563_s27 }
  0xed   : > { %p1150_p0 = scmp.ne.s32.totalorder %s1148_s24, %s1149_s16  ;;  %p1155_p4 = scmp.lt.s32.totalorder %s1153_s30, %s1149_s16 }
  0xef   : > { %p1151_p1 = pnand %p1150_p0, %p1364_p9  ;;  %p1156_p5 = por %p1155_p4, %p1154_p3 }
  0xf1   : > { %p1152_p2 = pneg %p1151_p1 }
  0xf3   : > { %p1157_p6 = pnand %p1156_p5, %p1152_p2 }
  0xf5   : > { %1160 = shalt.err (!%p1157_p6)
}
  0xf6   : > { %967 = dma.vmem_to_hbm [thread:$0]  (%p1364_p9), %s736_s29, 128, %s738_s12, %s1460_s25   ;;  %v609_v39 = vpop.permute.xlu1 %608 }
  0xf7   : > { %s1564_s22 = sld [smem:[#allocation21_spill]]  ;;  %s447_s28 = scalar_lea.vmem [#allocation7], %s1395_s8 }
  0xf8   : > { %s701_s24 = sshll.u32 %s447_s28, 4  ;;  %s676_s25 = scalar_lea.sflag [#allocation4], %s1392_s21  ;;  %s702_s24 = int_to_ptr.vmem [resolvable:$true] %s701_s24 }
  0xfd   : > { %s699_s23 = scalar_lea.hbm %s1564_s22, %s1449_s17  ;;  %s1181_s8 = scalar_lea.hbm %s1564_s22, 16 }
  0xfe   : > { %s703_s16 = sshll.u32 %s699_s23, 4  ;;  %s704_s16 = int_to_ptr.hbm [resolvable:$true] %s703_s16 }
  0xff   : > { %s1175_s29 = sshra.s32 %s704_s16, 4  ;;  %s1176_s29 = int_to_ptr.hbm [resolvable:$true] %s1175_s29 }
 0x100   : > { %s1177_s12 = scalar_lea.hbm %s1176_s29, 8  ;;  %p1182_p13 = scmp.lt.s32.totalorder %s1176_s29, %s1564_s22 }
 0x101   : > { %p1178_p7 = scmp.ne.s32.totalorder %s1176_s29, %s1177_s12  ;;  %p1183_p0 = scmp.lt.s32.totalorder %s1181_s8, %s1177_s12 }
 0x103   : > { %p1179_p8 = pnand %p1178_p7, %p1364_p9  ;;  %p1184_p1 = por %p1183_p0, %p1182_p13 }
 0x105   : > { %p1180_p10 = pneg %p1179_p8 }
 0x107   : > { %p1185_p2 = pnand %p1184_p1, %p1180_p10 }
 0x15d   : > { %v659_v40 = vpop.f32.mrf.mxu1  ;;  %v639_v41 = vpop.f32.mrf.mxu0 }
 0x15e   : > { %v660_v42 = vadd.f32 %v659_v40, %v609_v39  ;;  %v640_v44 = vadd.f32 %v639_v41, %v609_v39 }
 0x160   : > { %v664_v43 = vrot.slane %v660_v42, 4 }
 0x162   : > { %v665_v45 = vsel %vm483_vm0, %v640_v44, %v664_v43 }
 0x163   : > { %667 = vst [vmem:[%s447_s28] sm:$0xff] %v665_v45 }
 0x164   : > { %1188 = shalt.err (!%p1185_p2)
}
 0x165   : > { %965 = dma.vmem_to_hbm [thread:$0]  (%p1364_p9), %s702_s24, 128, %s704_s16, %s676_s25  }
 0x166 PF: > { %s1565_s21 = sld [smem:[#allocation15_spill]]  ;;  %p979_p3 = pnand %p920_p12, %p1373_p11 }
 0x168   : > { %p980_p4 = pneg %p979_p3 }
 0x16c   : > { %s749_s15 = sand.u32 1, %s1565_s21  }
 0x16d   : > { %s750_s10 = scalar_lea.sflag [#allocation4], %s749_s15 }
 0x16e   : > { %1222 = dma.done.wait (%p980_p4), %s750_s10, 128  }
 0x16f   : > { %1224 = vsyncadd (%p980_p4), %s750_s10, 4294967168  ;;  %s1567_s19 = sadd.s32 4294967294, %s1251_s18  }
 0x170   : > { %s759_s23 = sand.u32 1, %s1567_s19  }
 0x171   : > { %s760_s28 = scalar_lea.sflag [#allocation9], %s759_s23 }
 0x172   : > { %1226 = dma.done.wait (%p980_p4), %s760_s28, 256  }
 0x173   : > { %1228 = vsyncadd (%p980_p4), %s760_s28, 4294967040  ;;  %s33_s18 = sadd.s32 1, %s1251_s18   ;;  %s1568_s26 = sld [smem:[#allocation16_spill]] }
 0x174   : > { %p30_p9 = scmp.ge.s32.totalorder %s33_s18, 4   ;;  %s1569_s15 = sld [smem:[#allocation19_spill]] }
 0x175   : > { %s1570_s16 = sld [smem:[#allocation17_spill]]  ;;  %s1572_s13 = smov %s1235_s14 }
 0x176   : > { %s1571_s17 = sld [smem:[#allocation18_spill]]  ;;  %32 = sbr.rel (!%p30_p9) target bundleno = 13 (0xd), region = 142 }
 0x179   : > { %s1573_s14 = smov %s1568_s26 }
 0x17b   :  { %776 = vsyncpa [#allocation3], 1 }
 0x17c   :  { %778 = vsyncpa [#allocation3 + $0x1], 1 }
 0x17d   :  { %779 = vsyncpa [#allocation6], 1 }
 0x17e   :  { %781 = vsyncpa [#allocation6 + $0x1], 1 }
 0x17f   :  { %782 = vsyncpa [#allocation4], 1 }
 0x180   :  { %784 = vsyncpa [#allocation4 + $0x1], 1 }
 0x181   :  { %785 = vsyncpa [#allocation9], 1 }
 0x182   :  { %787 = vsyncpa [#allocation9 + $0x1], 1 }

</bundles_post_ra>
